<compile_context>
chip_gen: v7x
topology: tpu7x:2x2x1
jax: 0.10.0
libtpu: 0.0.40
codegen_flags: <defaults>
</compile_context>

<pallas_src>
import math

import jax
import jax.numpy as jnp
import numpy as np
from jax import lax
from jax.experimental import pallas as pl
from jax.experimental.pallas import tpu as pltpu

# ----------------------------- config (small, synthetic) -----------------------------
B = 2          # batch
S = 8          # sequence length (<= n_ctx)
D = 32         # n_embd
N_HEAD = 4     # n_head
HD = D // N_HEAD
N_INNER = 4 * D
BS = B * S
EPS = 1e-5     # layer_norm_epsilon
SCALE_ATTN = True

PACK_LANES = 128           # lane width of the packed parameter slabs
# rows of the bias/gain slab
_ROW_LN1_G, _ROW_LN1_B, _ROW_LN2_G, _ROW_LN2_B = 0, 1, 2, 3
_ROW_B_APROJ, _ROW_B_MPROJ, _ROW_B_FC, _ROW_B_ATTN = 4, 5, 6, 7


# ----------------------------- in-kernel helpers -----------------------------
def _layernorm(x, gamma, beta):
    # biased variance, matches torch.nn.LayerNorm
    mu = jnp.mean(x, axis=-1, keepdims=True)
    var = jnp.mean((x - mu) ** 2, axis=-1, keepdims=True)
    return (x - mu) * lax.rsqrt(var + EPS) * gamma + beta


def _gelu_exact(x):
    # matches F.gelu default (erf-based, not tanh approximation)
    return 0.5 * x * (1.0 + lax.erf(x * (1.0 / math.sqrt(2.0))))


# ----------------------------- Pallas kernel -----------------------------
def codegen_block_kernel(
    x_ref,        # (BS, D)              activations
    bias_ref,     # (8, 128)             all gains / biases, one row each (lane-padded)
    wattn_ref,    # (D, 4*D) = (32, 128) [ c_attn.W (D,3D) | attn c_proj.W (D,D) ]
    wmlp_ref,     # (D+N_INNER, 128)     [ c_fc.W (D,N_INNER) ; mlp c_proj.W (N_INNER,D) pad ]
    out_ref,      # (BS, D)
):
    x = x_ref[...]                                         # (BS, D) f32, residual #1

    # ---- unpack the parameter slabs (static slices, no data movement beyond loads) ----
    ln1_g = bias_ref[_ROW_LN1_G:_ROW_LN1_G + 1, 0:D]
    ln1_b = bias_ref[_ROW_LN1_B:_ROW_LN1_B + 1, 0:D]
    ln2_g = bias_ref[_ROW_LN2_G:_ROW_LN2_G + 1, 0:D]
    ln2_b = bias_ref[_ROW_LN2_B:_ROW_LN2_B + 1, 0:D]
    b_aproj = bias_ref[_ROW_B_APROJ:_ROW_B_APROJ + 1, 0:D]
    b_mproj = bias_ref[_ROW_B_MPROJ:_ROW_B_MPROJ + 1, 0:D]
    b_fc = bias_ref[_ROW_B_FC:_ROW_B_FC + 1, 0:N_INNER]
    b_attn = bias_ref[_ROW_B_ATTN:_ROW_B_ATTN + 1, 0:3 * D]

    w_attn = wattn_ref[:, 0:3 * D]                         # (D, 3D)
    w_aproj = wattn_ref[:, 3 * D:4 * D]                    # (D, D)
    w_fc = wmlp_ref[0:D, :]                                # (D, N_INNER)
    w_mproj = wmlp_ref[D:D + N_INNER, 0:D]                 # (N_INNER, D)

    # ---- ln_1 ----
    h = _layernorm(x, ln1_g, ln1_b)                        # (BS, D)

    # ---- QKV projection: ONE dense MXU matmul ----
    qkv = jnp.dot(h, w_attn, preferred_element_type=jnp.float32) + b_attn   # (BS, 3D)

    # ---- head split: static lane slices + leading-dim stack (no MXU work) ----
    def head_slices(base):
        return [qkv[:, base + n * HD: base + (n + 1) * HD] for n in range(N_HEAD)]

    q = jnp.stack(head_slices(0), axis=0)                  # (NH, BS, HD)
    k = jnp.stack(head_slices(D), axis=0)
    v = jnp.stack(head_slices(2 * D), axis=0)

    scale = (1.0 / math.sqrt(HD)) if SCALE_ATTN else 1.0
    q = q * scale                                          # fold 1/sqrt(HD) into q

    # group (head, batch) into one leading batch axis; sublane-tile-aligned reshape
    q = q.reshape(N_HEAD * B, S, HD)                       # (NH*B, S, HD)
    k = k.reshape(N_HEAD * B, S, HD)
    v = v.reshape(N_HEAD * B, S, HD)

    # ---- scores: one batched contraction over all (head, batch) pairs ----
    scores = jnp.einsum("bqd,bkd->bqk", q, k,
                        preferred_element_type=jnp.float32)        # (NH*B, S, S)

    # causal mask (lower triangular), masked positions -> -10000.0 (as in the torch code)
    row = lax.broadcasted_iota(jnp.int32, (S, S), 0)
    col = lax.broadcasted_iota(jnp.int32, (S, S), 1)
    scores = jnp.where((row >= col)[None], scores, -10000.0)

    # stable softmax with an exact divide (tiny; VALU is not the bottleneck here)
    m = jnp.max(scores, axis=-1, keepdims=True)
    p = jnp.exp(scores - m)
    p = p / jnp.sum(p, axis=-1, keepdims=True)

    ao = jnp.einsum("bqk,bkd->bqd", p, v,
                    preferred_element_type=jnp.float32)            # (NH*B, S, HD)

    # ---- merge heads back to (BS, D): leading-dim regroup + lane concat ----
    ao = ao.reshape(N_HEAD, BS, HD)                                # (NH, BS, HD)
    merged = jnp.concatenate([ao[n] for n in range(N_HEAD)], axis=1)   # (BS, D)

    # ---- attention output projection: ONE dense MXU matmul ----
    attn_out = jnp.dot(merged, w_aproj, preferred_element_type=jnp.float32) + b_aproj
    h1 = x + attn_out                                              # residual #1 add

    # ---- ln_2 ----
    h2 = _layernorm(h1, ln2_g, ln2_b)

    # ---- MLP: c_fc -> GELU -> c_proj + residual ----
    ff = jnp.dot(h2, w_fc, preferred_element_type=jnp.float32) + b_fc
    ff = _gelu_exact(ff)
    ff = jnp.dot(ff, w_mproj, preferred_element_type=jnp.float32) + b_mproj

    out_ref[...] = (h1 + ff).astype(out_ref.dtype)


# ----------------------------- wrapper -----------------------------
def codegen_block(x, params):
    (ln1_g, ln1_b, w_attn, b_attn, w_aproj, b_aproj,
     ln2_g, ln2_b, w_fc, b_fc, w_mproj, b_mproj) = params

    # packing layout assumptions for this toy config
    assert 3 * D <= PACK_LANES and N_INNER <= PACK_LANES and 4 * D == PACK_LANES

    def pad_lanes(v, width=PACK_LANES):                    # (1, n) / (r, n) -> lane-pad to width
        return jnp.pad(v, ((0, 0), (0, width - v.shape[1])))

    # ---- pack parameters into a few lane-dense slabs (plain XLA ops, wrapper-side) ----
    bias_slab = jnp.concatenate(
        [pad_lanes(ln1_g), pad_lanes(ln1_b), pad_lanes(ln2_g), pad_lanes(ln2_b),
         pad_lanes(b_aproj), pad_lanes(b_mproj), pad_lanes(b_fc), pad_lanes(b_attn)],
        axis=0)                                                        # (8, 128)
    attn_w_slab = jnp.concatenate([w_attn, w_aproj], axis=1)           # (D, 4D) = (32, 128)
    mlp_w_slab = jnp.concatenate([w_fc, pad_lanes(w_mproj, N_INNER)], axis=0)  # (160, 128)

    x2 = x.reshape(BS, D)                                              # fold batch into rows
    # TODO(synk): at real CodeGen sizes keep D a multiple of 128 so x/out stores are full vst.

    # advisory cost estimate for XLA scheduling around the custom call
    flops = (2 * BS * D * 3 * D                    # qkv projection
             + 2 * 2 * (N_HEAD * B) * S * S * HD   # QK^T + PV
             + 2 * BS * D * D                      # attn out projection
             + 2 * BS * D * N_INNER                # c_fc
             + 2 * BS * N_INNER * D)               # mlp c_proj
    transcendentals = (N_HEAD * B) * S * S + BS * N_INNER + 2 * BS
    bytes_accessed = 4 * int(2 * BS * D + bias_slab.size + attn_w_slab.size + mlp_w_slab.size)

    in_specs = [pl.BlockSpec(memory_space=pltpu.MemorySpace.VMEM) for _ in range(4)]

    out2 = pl.pallas_call(
        codegen_block_kernel,
        out_shape=jax.ShapeDtypeStruct((BS, D), jnp.float32),
        in_specs=in_specs,
        out_specs=pl.BlockSpec(memory_space=pltpu.MemorySpace.VMEM),
        cost_estimate=pl.CostEstimate(flops=flops,
                                      transcendentals=transcendentals,
                                      bytes_accessed=bytes_accessed),
    )(x2, bias_slab, attn_w_slab, mlp_w_slab)

    return out2.reshape(B, S, D)


# ----------------------------- pure-JAX reference -----------------------------
def reference_block(x, params):
    (ln1_g, ln1_b, w_attn, b_attn, w_aproj, b_aproj,
     ln2_g, ln2_b, w_fc, b_fc, w_mproj, b_mproj) = params

    def ln(t, g, bta):
        mu = jnp.mean(t, -1, keepdims=True)
        var = jnp.mean((t - mu) ** 2, -1, keepdims=True)
        return (t - mu) / jnp.sqrt(var + EPS) * g[0] + bta[0]

    residual = x
    h = ln(x, ln1_g, ln1_b)
    qkv = h @ w_attn + b_attn[0]
    q, k, v = jnp.split(qkv, 3, axis=-1)

    def heads(t):  # (B,S,D) -> (B,NH,S,HD)
        return t.reshape(B, S, N_HEAD, HD).transpose(0, 2, 1, 3)

    q, k, v = heads(q), heads(k), heads(v)
    scores = jnp.einsum("bhqd,bhkd->bhqk", q, k) / math.sqrt(HD)
    mask = jnp.tril(jnp.ones((S, S), dtype=bool))
    scores = jnp.where(mask[None, None], scores, -10000.0)
    p = jax.nn.softmax(scores, axis=-1)
    attn = jnp.einsum("bhqk,bhkd->bhqd", p, v)
    attn = attn.transpose(0, 2, 1, 3).reshape(B, S, D)
    attn = attn @ w_aproj + b_aproj[0]
    h1 = residual + attn

    h2 = ln(h1, ln2_g, ln2_b)
    ff = h2 @ w_fc + b_fc[0]
    ff = 0.5 * ff * (1.0 + lax.erf(ff / math.sqrt(2.0)))
    ff = ff @ w_mproj + b_mproj[0]
    return h1 + ff


# ----------------------------- main -----------------------------
if __name__ == "__main__":
    key = jax.random.PRNGKey(0)
    keys = jax.random.split(key, 12)

    x = jax.random.normal(keys[0], (B, S, D), dtype=jnp.float32)

    # Deterministic parameter init (PyTorch nn.Linear uses (out, in); we store pre-transposed).
    def w_init(k, in_f, out_f):
        return 0.02 * jax.random.normal(k, (in_f, out_f), dtype=jnp.float32)

    params = (
        jnp.ones((1, D), jnp.float32),                        # ln_1.weight
        jnp.zeros((1, D), jnp.float32),                       # ln_1.bias
        w_init(keys[1], D, 3 * D),                            # c_attn.weight^T
        0.01 * jax.random.normal(keys[2], (1, 3 * D)),        # c_attn.bias
        w_init(keys[3], D, D),                                # attn c_proj.weight^T
        0.01 * jax.random.normal(keys[4], (1, D)),            # attn c_proj.bias
        jnp.ones((1, D), jnp.float32),                        # ln_2.weight
        jnp.zeros((1, D), jnp.float32),                       # ln_2.bias
        w_init(keys[5], D, N_INNER),                          # c_fc.weight^T
        0.01 * jax.random.normal(keys[6], (1, N_INNER)),      # c_fc.bias
        w_init(keys[7], N_INNER, D),                          # mlp c_proj.weight^T
        0.01 * jax.random.normal(keys[8], (1, D)),            # mlp c_proj.bias
    )

    out = codegen_block(x, params)
    out = jax.block_until_ready(out)

    ref = reference_block(x, params)
    # tolerance covers MXU f32 pass behavior (Pallas matmul vs XLA dot) and the 1/sqrt(HD)
    # fold into q; all elementwise math (LN, softmax, erf-GELU) is exact f32.
    np.testing.assert_allclose(np.asarray(out), np.asarray(ref), rtol=1e-3, atol=1e-3)

    print("KERNEL_OK")
</pallas_src>

<mosaic_0001>
module attributes {stable_mosaic.version = 11 : i64} {
  func.func @codegen_block_kernel(%arg0: memref<16x32xf32, #tpu.memory_space<vmem>>, %arg1: memref<8x128xf32, #tpu.memory_space<vmem>>, %arg2: memref<32x128xf32, #tpu.memory_space<vmem>>, %arg3: memref<160x128xf32, #tpu.memory_space<vmem>>, %arg4: memref<16x32xf32, #tpu.memory_space<vmem>>) attributes {dimension_semantics = [], scalar_prefetch = 0 : i64, scratch_operands = 0 : i64, tpu.core_type = #tpu.core_type<tc>} {
    %c0 = arith.constant 0 : index
    %c0_0 = arith.constant 0 : index
    %0 = vector.load %arg0[%c0, %c0_0] : memref<16x32xf32, #tpu.memory_space<vmem>>, vector<16x32xf32>
    %c0_1 = arith.constant 0 : index
    %c0_2 = arith.constant 0 : index
    %1 = vector.load %arg1[%c0_1, %c0_2] : memref<8x128xf32, #tpu.memory_space<vmem>>, vector<1x32xf32>
    %c1 = arith.constant 1 : index
    %c0_3 = arith.constant 0 : index
    %2 = vector.load %arg1[%c1, %c0_3] : memref<8x128xf32, #tpu.memory_space<vmem>>, vector<1x32xf32>
    %c2 = arith.constant 2 : index
    %c0_4 = arith.constant 0 : index
    %3 = vector.load %arg1[%c2, %c0_4] : memref<8x128xf32, #tpu.memory_space<vmem>>, vector<1x32xf32>
    %c3 = arith.constant 3 : index
    %c0_5 = arith.constant 0 : index
    %4 = vector.load %arg1[%c3, %c0_5] : memref<8x128xf32, #tpu.memory_space<vmem>>, vector<1x32xf32>
    %c4 = arith.constant 4 : index
    %c0_6 = arith.constant 0 : index
    %5 = vector.load %arg1[%c4, %c0_6] : memref<8x128xf32, #tpu.memory_space<vmem>>, vector<1x32xf32>
    %c5 = arith.constant 5 : index
    %c0_7 = arith.constant 0 : index
    %6 = vector.load %arg1[%c5, %c0_7] : memref<8x128xf32, #tpu.memory_space<vmem>>, vector<1x32xf32>
    %c6 = arith.constant 6 : index
    %c0_8 = arith.constant 0 : index
    %7 = vector.load %arg1[%c6, %c0_8] : memref<8x128xf32, #tpu.memory_space<vmem>>, vector<1x128xf32>
    %c7 = arith.constant 7 : index
    %c0_9 = arith.constant 0 : index
    %8 = vector.load %arg1[%c7, %c0_9] : memref<8x128xf32, #tpu.memory_space<vmem>>, vector<1x96xf32>
    %c0_10 = arith.constant 0 : index
    %c0_11 = arith.constant 0 : index
    %9 = vector.load %arg2[%c0_10, %c0_11] : memref<32x128xf32, #tpu.memory_space<vmem>>, vector<32x96xf32>
    %c0_12 = arith.constant 0 : index
    %c96 = arith.constant 96 : index
    %10 = vector.load %arg2[%c0_12, %c96] : memref<32x128xf32, #tpu.memory_space<vmem>>, vector<32x32xf32>
    %c0_13 = arith.constant 0 : index
    %c0_14 = arith.constant 0 : index
    %11 = vector.load %arg3[%c0_13, %c0_14] : memref<160x128xf32, #tpu.memory_space<vmem>>, vector<32x128xf32>
    %c32 = arith.constant 32 : index
    %c0_15 = arith.constant 0 : index
    %12 = vector.load %arg3[%c32, %c0_15] : memref<160x128xf32, #tpu.memory_space<vmem>>, vector<128x32xf32>
    %cst = arith.constant dense<0.000000e+00> : vector<16xf32>
    %13 = vector.multi_reduction <add>, %0, %cst [1] : vector<16x32xf32> to vector<16xf32>
    %14 = vector.shape_cast %13 : vector<16xf32> to vector<16x1xf32>
    %cst_16 = arith.constant 3.200000e+01 : f32
    %15 = vector.broadcast %cst_16 : f32 to vector<16x1xf32>
    %16 = arith.divf %14, %15 : vector<16x1xf32>
    %17 = vector.broadcast %16 : vector<16x1xf32> to vector<16x32xf32>
    %18 = arith.subf %0, %17 : vector<16x32xf32>
    %19 = arith.mulf %18, %18 : vector<16x32xf32>
    %cst_17 = arith.constant dense<0.000000e+00> : vector<16xf32>
    %20 = vector.multi_reduction <add>, %19, %cst_17 [1] : vector<16x32xf32> to vector<16xf32>
    %21 = vector.shape_cast %20 : vector<16xf32> to vector<16x1xf32>
    %cst_18 = arith.constant 3.200000e+01 : f32
    %22 = vector.broadcast %cst_18 : f32 to vector<16x1xf32>
    %23 = arith.divf %21, %22 : vector<16x1xf32>
    %24 = vector.broadcast %16 : vector<16x1xf32> to vector<16x32xf32>
    %25 = arith.subf %0, %24 : vector<16x32xf32>
    %cst_19 = arith.constant 9.99999974E-6 : f32
    %26 = vector.broadcast %cst_19 : f32 to vector<16x1xf32>
    %27 = arith.addf %23, %26 : vector<16x1xf32>
    %28 = math.rsqrt %27 : vector<16x1xf32>
    %29 = vector.broadcast %28 : vector<16x1xf32> to vector<16x32xf32>
    %30 = arith.mulf %25, %29 : vector<16x32xf32>
    %31 = vector.broadcast %1 : vector<1x32xf32> to vector<16x32xf32>
    %32 = arith.mulf %30, %31 : vector<16x32xf32>
    %33 = vector.broadcast %2 : vector<1x32xf32> to vector<16x32xf32>
    %34 = arith.addf %32, %33 : vector<16x32xf32>
    %cst_20 = arith.constant dense<0.000000e+00> : vector<16x96xf32>
    %35 = tpu.matmul %34, %9, %cst_20 {dimension_numbers = #tpu.dot_dimension_numbers<[1], [0], [0], [1], [0, 0, 1, 1], [], []>} : vector<16x32xf32>, vector<32x96xf32>, vector<16x96xf32> -> vector<16x96xf32>
    %36 = vector.broadcast %8 : vector<1x96xf32> to vector<16x96xf32>
    %37 = arith.addf %35, %36 : vector<16x96xf32>
    %38 = vector.extract_strided_slice %37 {offsets = [0, 0], sizes = [16, 8], strides = [1, 1]} : vector<16x96xf32> to vector<16x8xf32>
    %39 = vector.extract_strided_slice %37 {offsets = [0, 8], sizes = [16, 8], strides = [1, 1]} : vector<16x96xf32> to vector<16x8xf32>
    %40 = vector.extract_strided_slice %37 {offsets = [0, 16], sizes = [16, 8], strides = [1, 1]} : vector<16x96xf32> to vector<16x8xf32>
    %41 = vector.extract_strided_slice %37 {offsets = [0, 24], sizes = [16, 8], strides = [1, 1]} : vector<16x96xf32> to vector<16x8xf32>
    %42 = vector.shape_cast %38 : vector<16x8xf32> to vector<1x16x8xf32>
    %43 = vector.shape_cast %39 : vector<16x8xf32> to vector<1x16x8xf32>
    %44 = vector.shape_cast %40 : vector<16x8xf32> to vector<1x16x8xf32>
    %45 = vector.shape_cast %41 : vector<16x8xf32> to vector<1x16x8xf32>
    %46 = tpu.concatenate %42, %43, %44, %45 in 0 : vector<1x16x8xf32>, vector<1x16x8xf32>, vector<1x16x8xf32>, vector<1x16x8xf32> -> vector<4x16x8xf32>
    %47 = vector.extract_strided_slice %37 {offsets = [0, 32], sizes = [16, 8], strides = [1, 1]} : vector<16x96xf32> to vector<16x8xf32>
    %48 = vector.extract_strided_slice %37 {offsets = [0, 40], sizes = [16, 8], strides = [1, 1]} : vector<16x96xf32> to vector<16x8xf32>
    %49 = vector.extract_strided_slice %37 {offsets = [0, 48], sizes = [16, 8], strides = [1, 1]} : vector<16x96xf32> to vector<16x8xf32>
    %50 = vector.extract_strided_slice %37 {offsets = [0, 56], sizes = [16, 8], strides = [1, 1]} : vector<16x96xf32> to vector<16x8xf32>
    %51 = vector.shape_cast %47 : vector<16x8xf32> to vector<1x16x8xf32>
    %52 = vector.shape_cast %48 : vector<16x8xf32> to vector<1x16x8xf32>
    %53 = vector.shape_cast %49 : vector<16x8xf32> to vector<1x16x8xf32>
    %54 = vector.shape_cast %50 : vector<16x8xf32> to vector<1x16x8xf32>
    %55 = tpu.concatenate %51, %52, %53, %54 in 0 : vector<1x16x8xf32>, vector<1x16x8xf32>, vector<1x16x8xf32>, vector<1x16x8xf32> -> vector<4x16x8xf32>
    %56 = vector.extract_strided_slice %37 {offsets = [0, 64], sizes = [16, 8], strides = [1, 1]} : vector<16x96xf32> to vector<16x8xf32>
    %57 = vector.extract_strided_slice %37 {offsets = [0, 72], sizes = [16, 8], strides = [1, 1]} : vector<16x96xf32> to vector<16x8xf32>
    %58 = vector.extract_strided_slice %37 {offsets = [0, 80], sizes = [16, 8], strides = [1, 1]} : vector<16x96xf32> to vector<16x8xf32>
    %59 = vector.extract_strided_slice %37 {offsets = [0, 88], sizes = [16, 8], strides = [1, 1]} : vector<16x96xf32> to vector<16x8xf32>
    %60 = vector.shape_cast %56 : vector<16x8xf32> to vector<1x16x8xf32>
    %61 = vector.shape_cast %57 : vector<16x8xf32> to vector<1x16x8xf32>
    %62 = vector.shape_cast %58 : vector<16x8xf32> to vector<1x16x8xf32>
    %63 = vector.shape_cast %59 : vector<16x8xf32> to vector<1x16x8xf32>
    %64 = tpu.concatenate %60, %61, %62, %63 in 0 : vector<1x16x8xf32>, vector<1x16x8xf32>, vector<1x16x8xf32>, vector<1x16x8xf32> -> vector<4x16x8xf32>
    %cst_21 = arith.constant 0.353553385 : f32
    %65 = vector.broadcast %cst_21 : f32 to vector<4x16x8xf32>
    %66 = arith.mulf %46, %65 : vector<4x16x8xf32>
    %67 = vector.shape_cast %66 : vector<4x16x8xf32> to vector<8x8x8xf32>
    %68 = vector.shape_cast %55 : vector<4x16x8xf32> to vector<8x8x8xf32>
    %69 = vector.shape_cast %64 : vector<4x16x8xf32> to vector<8x8x8xf32>
    "tpu.trace_start"() <{level = 10 : i32, message = "bqd,bkd->bqk"}> : () -> ()
    %cst_22 = arith.constant dense<0.000000e+00> : vector<8x8x8xf32>
    %70 = tpu.matmul %67, %68, %cst_22 {dimension_numbers = #tpu.dot_dimension_numbers<[2], [2], [1], [1], [0, 0, 0, 1, 1, 1], [0], [0]>} : vector<8x8x8xf32>, vector<8x8x8xf32>, vector<8x8x8xf32> -> vector<8x8x8xf32>
    "tpu.trace_stop"() : () -> ()
    %71 = tpu.iota {dimensions = array<i32: 0>} : vector<8x8xi32>
    %72 = tpu.iota {dimensions = array<i32: 1>} : vector<8x8xi32>
    %73 = arith.cmpi sge, %71, %72 : vector<8x8xi32>
    %74 = vector.shape_cast %73 : vector<8x8xi1> to vector<1x8x8xi1>
    %cst_23 = arith.constant -1.000000e+04 : f32
    %75 = vector.shape_cast %74 : vector<1x8x8xi1> to vector<1x8x8xi1>
    %76 = vector.broadcast %75 : vector<1x8x8xi1> to vector<8x8x8xi1>
    %77 = vector.broadcast %cst_23 : f32 to vector<8x8x8xf32>
    %78 = arith.select %76, %70, %77 : vector<8x8x8xi1>, vector<8x8x8xf32>
    %cst_24 = arith.constant dense<0xFF800000> : vector<8x8xf32>
    %79 = vector.multi_reduction <maximumf>, %78, %cst_24 [2] : vector<8x8x8xf32> to vector<8x8xf32>
    %80 = vector.shape_cast %79 : vector<8x8xf32> to vector<8x8x1xf32>
    %81 = vector.broadcast %80 : vector<8x8x1xf32> to vector<8x8x8xf32>
    %82 = arith.subf %78, %81 : vector<8x8x8xf32>
    %83 = math.exp %82 : vector<8x8x8xf32>
    %cst_25 = arith.constant dense<0.000000e+00> : vector<8x8xf32>
    %84 = vector.multi_reduction <add>, %83, %cst_25 [2] : vector<8x8x8xf32> to vector<8x8xf32>
    %85 = vector.shape_cast %84 : vector<8x8xf32> to vector<8x8x1xf32>
    %86 = vector.broadcast %85 : vector<8x8x1xf32> to vector<8x8x8xf32>
    %87 = arith.divf %83, %86 : vector<8x8x8xf32>
    "tpu.trace_start"() <{level = 10 : i32, message = "bqk,bkd->bqd"}> : () -> ()
    %cst_26 = arith.constant dense<0.000000e+00> : vector<8x8x8xf32>
    %88 = tpu.matmul %87, %69, %cst_26 {dimension_numbers = #tpu.dot_dimension_numbers<[2], [1], [1], [2], [0, 0, 0, 1, 1, 2], [0], [0]>} : vector<8x8x8xf32>, vector<8x8x8xf32>, vector<8x8x8xf32> -> vector<8x8x8xf32>
    "tpu.trace_stop"() : () -> ()
    %89 = vector.shape_cast %88 : vector<8x8x8xf32> to vector<4x16x8xf32>
    %90 = vector.extract_strided_slice %89 {offsets = [0, 0, 0], sizes = [1, 16, 8], strides = [1, 1, 1]} : vector<4x16x8xf32> to vector<1x16x8xf32>
    %91 = vector.shape_cast %90 : vector<1x16x8xf32> to vector<16x8xf32>
    %92 = vector.extract_strided_slice %89 {offsets = [1, 0, 0], sizes = [1, 16, 8], strides = [1, 1, 1]} : vector<4x16x8xf32> to vector<1x16x8xf32>
    %93 = vector.shape_cast %92 : vector<1x16x8xf32> to vector<16x8xf32>
    %94 = vector.extract_strided_slice %89 {offsets = [2, 0, 0], sizes = [1, 16, 8], strides = [1, 1, 1]} : vector<4x16x8xf32> to vector<1x16x8xf32>
    %95 = vector.shape_cast %94 : vector<1x16x8xf32> to vector<16x8xf32>
    %96 = vector.extract_strided_slice %89 {offsets = [3, 0, 0], sizes = [1, 16, 8], strides = [1, 1, 1]} : vector<4x16x8xf32> to vector<1x16x8xf32>
    %97 = vector.shape_cast %96 : vector<1x16x8xf32> to vector<16x8xf32>
    %98 = tpu.concatenate %91, %93, %95, %97 in 1 : vector<16x8xf32>, vector<16x8xf32>, vector<16x8xf32>, vector<16x8xf32> -> vector<16x32xf32>
    %cst_27 = arith.constant dense<0.000000e+00> : vector<16x32xf32>
    %99 = tpu.matmul %98, %10, %cst_27 {dimension_numbers = #tpu.dot_dimension_numbers<[1], [0], [0], [1], [0, 0, 1, 1], [], []>} : vector<16x32xf32>, vector<32x32xf32>, vector<16x32xf32> -> vector<16x32xf32>
    %100 = vector.broadcast %5 : vector<1x32xf32> to vector<16x32xf32>
    %101 = arith.addf %99, %100 : vector<16x32xf32>
    %102 = arith.addf %0, %101 : vector<16x32xf32>
    %cst_28 = arith.constant dense<0.000000e+00> : vector<16xf32>
    %103 = vector.multi_reduction <add>, %102, %cst_28 [1] : vector<16x32xf32> to vector<16xf32>
    %104 = vector.shape_cast %103 : vector<16xf32> to vector<16x1xf32>
    %cst_29 = arith.constant 3.200000e+01 : f32
    %105 = vector.broadcast %cst_29 : f32 to vector<16x1xf32>
    %106 = arith.divf %104, %105 : vector<16x1xf32>
    %107 = vector.broadcast %106 : vector<16x1xf32> to vector<16x32xf32>
    %108 = arith.subf %102, %107 : vector<16x32xf32>
    %109 = arith.mulf %108, %108 : vector<16x32xf32>
    %cst_30 = arith.constant dense<0.000000e+00> : vector<16xf32>
    %110 = vector.multi_reduction <add>, %109, %cst_30 [1] : vector<16x32xf32> to vector<16xf32>
    %111 = vector.shape_cast %110 : vector<16xf32> to vector<16x1xf32>
    %cst_31 = arith.constant 3.200000e+01 : f32
    %112 = vector.broadcast %cst_31 : f32 to vector<16x1xf32>
    %113 = arith.divf %111, %112 : vector<16x1xf32>
    %114 = vector.broadcast %106 : vector<16x1xf32> to vector<16x32xf32>
    %115 = arith.subf %102, %114 : vector<16x32xf32>
    %cst_32 = arith.constant 9.99999974E-6 : f32
    %116 = vector.broadcast %cst_32 : f32 to vector<16x1xf32>
    %117 = arith.addf %113, %116 : vector<16x1xf32>
    %118 = math.rsqrt %117 : vector<16x1xf32>
    %119 = vector.broadcast %118 : vector<16x1xf32> to vector<16x32xf32>
    %120 = arith.mulf %115, %119 : vector<16x32xf32>
    %121 = vector.broadcast %3 : vector<1x32xf32> to vector<16x32xf32>
    %122 = arith.mulf %120, %121 : vector<16x32xf32>
    %123 = vector.broadcast %4 : vector<1x32xf32> to vector<16x32xf32>
    %124 = arith.addf %122, %123 : vector<16x32xf32>
    %cst_33 = arith.constant dense<0.000000e+00> : vector<16x128xf32>
    %125 = tpu.matmul %124, %11, %cst_33 {dimension_numbers = #tpu.dot_dimension_numbers<[1], [0], [0], [1], [0, 0, 1, 1], [], []>} : vector<16x32xf32>, vector<32x128xf32>, vector<16x128xf32> -> vector<16x128xf32>
    %126 = vector.broadcast %7 : vector<1x128xf32> to vector<16x128xf32>
    %127 = arith.addf %125, %126 : vector<16x128xf32>
    %cst_34 = arith.constant 5.000000e-01 : f32
    %128 = vector.broadcast %cst_34 : f32 to vector<16x128xf32>
    %129 = arith.mulf %128, %127 : vector<16x128xf32>
    %cst_35 = arith.constant 0.707106769 : f32
    %130 = vector.broadcast %cst_35 : f32 to vector<16x128xf32>
    %131 = arith.mulf %127, %130 : vector<16x128xf32>
    %132 = math.erf %131 : vector<16x128xf32>
    %cst_36 = arith.constant 1.000000e+00 : f32
    %133 = vector.broadcast %cst_36 : f32 to vector<16x128xf32>
    %134 = arith.addf %133, %132 : vector<16x128xf32>
    %135 = arith.mulf %129, %134 : vector<16x128xf32>
    %cst_37 = arith.constant dense<0.000000e+00> : vector<16x32xf32>
    %136 = tpu.matmul %135, %12, %cst_37 {dimension_numbers = #tpu.dot_dimension_numbers<[1], [0], [0], [1], [0, 0, 1, 1], [], []>} : vector<16x128xf32>, vector<128x32xf32>, vector<16x32xf32> -> vector<16x32xf32>
    %137 = vector.broadcast %6 : vector<1x32xf32> to vector<16x32xf32>
    %138 = arith.addf %136, %137 : vector<16x32xf32>
    %139 = arith.addf %102, %138 : vector<16x32xf32>
    %c0_38 = arith.constant 0 : index
    %c0_39 = arith.constant 0 : index
    %140 = vector.load %arg4[%c0_38, %c0_39] : memref<16x32xf32, #tpu.memory_space<vmem>>, vector<16x32xf32>
    tpu.vector_store %arg4[%c0_38, %c0_39], %139 {strides = array<i32>} : memref<16x32xf32, #tpu.memory_space<vmem>>, vector<16x32xf32>,
    return
  }
}

</mosaic_0001>

<bundles_post_ra>
// kernel: tpu_custom_call.1
= control target key start
LH: loop header
LB: loop body
LE: loop exit
PB: predicated region body
PF: predicated region fallthrough
CT: control target
= control target key end

     0   :  { %9 = vsyncpa [#allocation3], 0  ;;  %s2824_s0 = inlined_call_operand.hbm [shape: f32[16,32], index: 0, kind: input, shape index: {}]   ;;  %s2825_s1 = inlined_call_operand.hbm [shape: f32[8,128], index: 1, kind: input, shape index: {}]   ;;  %s2826_s2 = inlined_call_operand.hbm [shape: f32[32,128], index: 2, kind: input, shape index: {}]   ;;  %s2827_s3 = inlined_call_operand.hbm [shape: f32[160,128], index: 3, kind: input, shape index: {}]   ;;  %s2828_s4 = inlined_call_operand.hbm [shape: f32[16,32], index: 4, kind: output, shape index: {}]  }
   0x1   :  { %10 = vsyncpa [#allocation6], 0 }
   0x2   :  { %11 = vsyncpa [#allocation9], 0 }
   0x3   :  { %12 = vsyncpa [#allocation4], 0  ;;  %s2455_s15 = smov [#allocation5]   ;;  %s2456_s17 = smov [#allocation2]  }
   0x4   :  { %s31_s16 = sshll.u32 %s2455_s15, 4  ;;  %s18_s18 = sshll.u32 %s2456_s17, 4  ;;  %s32_s16 = int_to_ptr.vmem [resolvable:$true] %s31_s16  ;;  %s2497_s18 = int_to_ptr.vmem [resolvable:$true] %s18_s18 }
   0x5   :  { %s2337_s21 = scalar_lea.hbm %s2825_s1, 128 }
   0x6   :  { %p2338_p0 = scmp.ne.s32.totalorder %s2825_s1, %s2337_s21  ;;  %p2341_p1 = scmp.lt.u32.totalorder %s2337_s21, %s2825_s1 }
   0x8   :  { %p2343_p2 = pnand %p2341_p1, %p2338_p0 }
   0xa   :  { %2346 = shalt.err (!%p2343_p2)
}
   0xb   :  { %s2347_s26 = scalar_lea.vmem %s32_s16, 128  ;;  %p2352_p4 = scmp.lt.s32.totalorder %s32_s16, %s32_s16 }
   0xc   :  { %p2348_p3 = scmp.ne.s32.totalorder %s32_s16, %s2347_s26  ;;  %p2353_p5 = scmp.lt.s32.totalorder %s2347_s26, %s2347_s26 }
   0xe   :  { %p2354_p6 = por %p2353_p5, %p2352_p4 }
  0x10   :  { %p2355_p7 = pnand %p2354_p6, %p2348_p3 }
  0x12   :  { %2358 = shalt.err (!%p2355_p7)
}
  0x13   :  { %34 = dma.hbm_to_vmem [thread:$0]  %s2825_s1, 128, %s32_s16, [#allocation6]  }
  0x14   :  { %s2359_s5 = scalar_lea.hbm %s2824_s0, 256 }
  0x15   :  { %p2360_p8 = scmp.ne.s32.totalorder %s2824_s0, %s2359_s5  ;;  %p2363_p9 = scmp.lt.u32.totalorder %s2359_s5, %s2824_s0 }
  0x17   :  { %p2365_p10 = pnand %p2363_p9, %p2360_p8 }
  0x19   :  { %2368 = shalt.err (!%p2365_p10)
}
  0x1a   :  { %s2369_s10 = scalar_lea.vmem %s2497_s18, 256  ;;  %p2374_p12 = scmp.lt.s32.totalorder %s2497_s18, %s2497_s18 }
  0x1b   :  { %p2370_p11 = scmp.ne.s32.totalorder %s2497_s18, %s2369_s10  ;;  %p2375_p13 = scmp.lt.s32.totalorder %s2369_s10, %s2369_s10 }
  0x1d   :  { %p2376_p0 = por %p2375_p13, %p2374_p12 }
  0x1f   :  { %p2377_p1 = pnand %p2376_p0, %p2370_p11 }
  0x21   :  { %2380 = shalt.err (!%p2377_p1)
}
  0x22   :  { %s2457_s1 = smov 128   ;;  %s2458_s11 = smov 8  }
  0x23   :  { %24 = dma.hbm_to_vmem [thread:$0]  %s2824_s0, 256, %s2497_s18, [#allocation3], %s2457_s1, %s2457_s1, %s2458_s11  }
  0x24   :  { %s2459_s14 = smov [#allocation7]   ;;  %s2460_s16 = smov [#allocation8]  }
  0x25   :  { %s40_s15 = sshll.u32 %s2459_s14, 4  ;;  %s52_s17 = sshll.u32 %s2460_s16, 4  ;;  %s41_s15 = int_to_ptr.vmem [resolvable:$true] %s40_s15  ;;  %s2531_s17 = int_to_ptr.vmem [resolvable:$true] %s52_s17 }
  0x26   :  { %s2381_s21 = scalar_lea.hbm %s2826_s2, 512 }
  0x27   :  { %p2382_p2 = scmp.ne.s32.totalorder %s2826_s2, %s2381_s21  ;;  %p2385_p3 = scmp.lt.u32.totalorder %s2381_s21, %s2826_s2 }
  0x29   :  { %p2387_p4 = pnand %p2385_p3, %p2382_p2 }
  0x2b   :  { %2390 = shalt.err (!%p2387_p4)
}
  0x2c   :  { %s2391_s0 = scalar_lea.vmem %s41_s15, 512  ;;  %p2396_p6 = scmp.lt.s32.totalorder %s41_s15, %s41_s15 }
  0x2d   :  { %p2392_p5 = scmp.ne.s32.totalorder %s41_s15, %s2391_s0  ;;  %p2397_p7 = scmp.lt.s32.totalorder %s2391_s0, %s2391_s0 }
  0x2f   :  { %p2398_p8 = por %p2397_p7, %p2396_p6 }
  0x31   :  { %p2399_p9 = pnand %p2398_p8, %p2392_p5 }
  0x33   :  { %2402 = shalt.err (!%p2399_p9)
}
  0x34   :  { %46 = dma.hbm_to_vmem [thread:$0]  %s2826_s2, 512, %s41_s15, [#allocation6], %s2457_s1, %s2457_s1, %s2458_s11  }
  0x35   :  { %s2403_s29 = scalar_lea.hbm %s2827_s3, 2560 }
  0x36   :  { %p2404_p10 = scmp.ne.s32.totalorder %s2827_s3, %s2403_s29  ;;  %p2407_p11 = scmp.lt.u32.totalorder %s2403_s29, %s2827_s3 }
  0x38   :  { %p2409_p12 = pnand %p2407_p11, %p2404_p10 }
  0x3a   :  { %2412 = shalt.err (!%p2409_p12)
}
  0x3b   :  { %s2413_s8 = scalar_lea.vmem %s2531_s17, 2560  ;;  %p2418_p0 = scmp.lt.s32.totalorder %s2531_s17, %s2531_s17 }
  0x3c   :  { %p2414_p13 = scmp.ne.s32.totalorder %s2531_s17, %s2413_s8  ;;  %p2419_p1 = scmp.lt.s32.totalorder %s2413_s8, %s2413_s8 }
  0x3e   :  { %p2420_p2 = por %p2419_p1, %p2418_p0 }
  0x40   :  { %p2421_p3 = pnand %p2420_p2, %p2414_p13 }
  0x42   :  { %2424 = shalt.err (!%p2421_p3)
}
  0x43   :  { %58 = dma.hbm_to_vmem [thread:$0]  %s2827_s3, 2560, %s2531_s17, [#allocation9], %s2457_s1, %s2457_s1, %s2458_s11  }
  0x44   :  { %2447 = dma.done.wait [#allocation3], 256  }
  0x45   :  { %2448 = vsyncadd [#allocation3], 4294967040 }
  0x46   :  { %2449 = dma.done.wait [#allocation6], 640  }
  0x47   :  { %2450 = vsyncadd [#allocation6], 4294966656 }
  0x48   :  { %2451 = dma.done.wait [#allocation9], 2560  }
  0x49   :  { %2452 = vsyncadd [#allocation9], 4294964736  ;;  %vm105_vm0 = vcmask 261120   ;;  %v2568_v0 = vld [vmem:[#allocation2] sm:$0xff]  ;;  %v2570_v1 = vld [vmem:[#allocation2 + $0x8] sm:$0xff]  ;;  %v2461_v38 = vmov 0.0  }
  0x4a   :  { %v106_v2 = vsel %vm105_vm0, %v2568_v0, 0.0  ;;  %v109_v3 = vsel %vm105_vm0, %v2570_v1, 0.0  ;;  %v2580_v14 = vld [vmem:[#allocation7] sm:$0xff]  ;;  %v2582_v15 = vld [vmem:[#allocation7 + $0x8] sm:$0xff]  ;;  %v2584_v16 = vld [vmem:[#allocation7 + $0x10] sm:$0xff]  ;;  %2083 = vmatprep.subr.mxu0 %v2461_v38  ;;  %vm2462_vm1 = vmmov 0  }
  0x4b   :  { %107 = vadd.xlane.f32.xlu0 %v106_v2  ;;  %v2283_v17 = vpack.i.bf16 %v2582_v15, %v2580_v14  ;;  %v2210_v18 = vpack.c.bf16 %v2582_v15, %v2580_v14  ;;  %v2590_v19 = vld [vmem:[#allocation7 + $0x18] sm:$0xff]  ;;  %2085 = vmatprep.mubr.msk.f32.mxu0 %vm2462_vm1, %v2461_v38  ;;  %s2463_s3 = smov 120   ;;  %s2464_s10 = smov 112   ;;  %vm260_vm2 = vcmask 64512   ;;  %vm1612_vm4 = vcmask 130048  }
  0x4c   :  { %v2214_v20 = vpack.c.bf16 %v2590_v19, %v2584_v16  ;;  %v1956_v28 = vld [vmem:[#allocation5] ss:$0 sm:$0xff]  ;;  %v1957_v30 = vld [vmem:[#allocation5 + $0x1] ss:$0 sm:$0xff]  ;;  %v1958_v37 = vld [vmem:[#allocation5 + $0x7] ss:$0 sm:$0xff] }
  0x4d   :  { %2211 = vmatprep.subr.bf16.mxu1 %v2210_v18  ;;  %s2465_s12 = smov 104   ;;  %s2466_s13 = smov 96   ;;  %vm1615_vm5 = vcmask 195584  }
  0x4e   :  { %2213 = vmatpush3.bf16.msra.mxu1 %v2210_v18  ;;  %s2467_s14 = smov 64   ;;  %s2468_s15 = smov 32  }
  0x4f   :  { %110 = vadd.xlane.f32.xlu0 %v109_v3  ;;  %2215 = vmatprep.subr.bf16.mxu1 %v2214_v20  ;;  %v875_v3 = vlaneseq  ;;  %s2469_s16 = smov 16   ;;  %s2470_s17 = smov 24  }
  0x50   :  { %s2471_s19 = smov [#allocation10]  }
  0x51   :  { %s1942_s20 = sshll.u32 %s2471_s19, 4  ;;  %s1943_s20 = int_to_ptr.vmem [resolvable:$true] %s1942_s20 }
  0x52   :  { %2217 = vmatpush3.bf16.msra.mxu1 %v2214_v20  ;;  %s2425_s21 = scalar_lea.vmem %s1943_s20, 256  ;;  %p2430_p5 = scmp.lt.s32.totalorder %s1943_s20, %s1943_s20 }
  0x53   :  { %2073 = vmatprep.subr.mxu1 %v2461_v38  ;;  %p2426_p4 = scmp.ne.s32.totalorder %s1943_s20, %s2425_s21  ;;  %p2431_p6 = scmp.lt.s32.totalorder %s2425_s21, %s2425_s21 }
  0x55   :  { %p2432_p7 = por %p2431_p6, %p2430_p5 }
  0x57   :  { %p2433_p8 = pnand %p2432_p7, %p2426_p4 }
  0xd8   :  { %v108_v4 = vpop.xlane.xlu0 %107 }
  0xd9   :  { %v113_v5 = vmul.f32 0.03125, %v108_v4  ;;  %v876_v4 = vshrl.u32 %v875_v3, 7 }
  0xdb   :  { %v115_v6 = vsub.f32 %v2568_v0, %v113_v5  ;;  %v878_v5 = vand.u32 127, %v875_v3 }
  0xdc   :  { %v111_v7 = vpop.xlane.xlu0 %110 }
  0xdd   :  { %v114_v8 = vmul.f32 0.03125, %v111_v7  ;;  %v117_v9 = vmul.f32 %v115_v6, %v115_v6  ;;  %vm2680_vm3 = vcmp.ge.s32.totalorder %v876_v4, %v878_v5 }
  0xdf   :  { %v116_v10 = vsub.f32 %v2570_v1, %v114_v8  ;;  %v119_v11 = vsel %vm105_vm0, %v117_v9, 0.0 }
  0xe0   :  { %120 = vadd.xlane.f32.xlu1 %v119_v11 }
  0xe1   :  { %v118_v12 = vmul.f32 %v116_v10, %v116_v10 }
  0xe3   :  { %v122_v13 = vsel %vm105_vm0, %v118_v12, 0.0 }
  0xe4   :  { %123 = vadd.xlane.f32.xlu1 %v122_v13 }
 0x16d   :  { %v121_v21 = vpop.xlane.xlu1 %120 }
 0x16e   :  { %v125_v22 = vmul.f32 0.03125, %v121_v21 }
 0x170   :  { %v127_v23 = vadd.f32 1e-05, %v125_v22 }
 0x171   :  { %v124_v24 = vpop.xlane.xlu1 %123 }
 0x172   :  { %2293 = vrsqrt.f32 %v127_v23  ;;  %v126_v25 = vmul.f32 0.03125, %v124_v24 }
 0x174   :  { %v128_v26 = vadd.f32 1e-05, %v126_v25 }
 0x176   :  { %2295 = vrsqrt.f32 %v128_v26 }
 0x17c   :  { %v2294_v27 = vpop.eup %2293 }
 0x17d   :  { %v131_v29 = vmul.f32 %v2294_v27, %v115_v6 }
 0x17f   :  { %v137_v31 = vmul.f32 %v1956_v28, %v131_v29 }
 0x180   :  { %v2296_v32 = vpop.eup %2295 }
 0x181   :  { %v132_v33 = vmul.f32 %v2296_v32, %v116_v10  ;;  %v143_v34 = vadd.f32 %v1957_v30, %v137_v31 }
 0x183   :  { %v138_v35 = vmul.f32 %v1956_v28, %v132_v33  ;;  %2070 = vmatprep.mubr.msk.f32.mxu1 %vm105_vm0, %v143_v34 }
 0x185   :  { %v144_v36 = vadd.f32 %v1957_v30, %v138_v35 }
 0x187   :  { %2071 = vmatmul.mubr.msk.f32.vlgmr.msra.gmra.mrb[0].mxu1 %vm105_vm0, %v144_v36 }
 0x188   :  { %2075 = vmatprep.mubr.msk.f32.mxu1 %vm2462_vm1, %v2461_v38 }
 0x25a   :  { %v2072_v39 = vpop.f32.mrb[0].mxu1 }
 0x25b   :  { %v2602_v40 = vadd.f32 %v2072_v39, %v1958_v37  ;;  %v221_v41 = vpop.f32.mrb[1].mxu1 }
 0x25c   :  { %v2604_v42 = vadd.f32 %v1958_v37, %v221_v41 }
 0x25d   :  { %234 = vrot.lane.b32.xlu1 %v2602_v40, %s2463_s3  ;;  %v251_v52 = vmul.f32 0.35355338, %v2602_v40 }
 0x25e   :  { %232 = vrot.lane.b32.xlu0 %v2604_v42, %s2463_s3  ;;  %v250_v49 = vmul.f32 0.35355338, %v2604_v42 }
 0x261   :  { %238 = vrot.lane.b32.xlu1 %v2604_v42, %s2464_s10 }
 0x262   :  { %244 = vrot.lane.b32.xlu0 %v2604_v42, %s2465_s12 }
 0x265   :  { %240 = vrot.lane.b32.xlu1 %v2602_v40, %s2464_s10 }
 0x266   :  { %258 = vrot.lane.b32.xlu0 %v2604_v42, %s2466_s13 }
 0x269   :  { %246 = vrot.lane.b32.xlu1 %v2602_v40, %s2465_s12 }
 0x26d   :  { %336 = vrot.lane.b32.xlu1 %v2602_v40, %s2466_s13 }
 0x2cf   :  { %v2614_v43 = vpop.permute.xlu1 %234 }
 0x2d0   :  { %490 = vrot.lane.b32.xlu1 %v2614_v43, %s2466_s13  ;;  %v2617_v44 = vpop.permute.xlu0 %232  ;;  %v253_v55 = vmul.f32 0.35355338, %v2614_v43 }
 0x2d1   :  { %413 = vrot.lane.b32.xlu0 %v2617_v44, %s2466_s13  ;;  %v252_v56 = vmul.f32 0.35355338, %v2617_v44 }
 0x2d3   :  { %v2620_v45 = vpop.permute.xlu1 %238 }
 0x2d4   :  { %v2622_v46 = vpop.permute.xlu0 %244  ;;  %v254_v58 = vmul.f32 0.35355338, %v2620_v45 }
 0x2d5   :  { %567 = vrot.lane.b32.xlu0 %v2620_v45, %s2466_s13  ;;  %v256_v62 = vmul.f32 0.35355338, %v2622_v46 }
 0x2d7   :  { %v2625_v47 = vpop.permute.xlu1 %240 }
 0x2d8   :  { %644 = vrot.lane.b32.xlu1 %v2625_v47, %s2466_s13  ;;  %v259_v48 = vpop.permute.xlu0 %258  ;;  %v255_v61 = vmul.f32 0.35355338, %v2625_v47 }
 0x2d9   :  { %721 = vrot.lane.b32.xlu0 %v2622_v46, %s2466_s13  ;;  %2074 = vmatpush3.xpose.msk.msra.mxu1 %vm260_vm2, %v259_v48 }
 0x2da   :  { %2078 = vmatprep.subr.mxu1 %v2461_v38 }
 0x2db   :  { %v2632_v50 = vpop.permute.xlu1 %246 }
 0x2dc   :  { %798 = vrot.lane.b32.xlu1 %v2632_v50, %s2466_s13  ;;  %2076 = vmatmul.mubr.msk.f32.vlgmr.msra.gmra.mrb[2].mxu1 %vm260_vm2, %v250_v49  ;;  %v257_v2 = vmul.f32 0.35355338, %v2632_v50 }
 0x2dd   :  { %2080 = vmatprep.mubr.msk.f32.mxu1 %vm2462_vm1, %v2461_v38 }
 0x2df   :  { %v337_v51 = vpop.permute.xlu1 %336 }
 0x2e0   :  { %2079 = vmatpush3.xpose.msk.msra.mxu1 %vm260_vm2, %v337_v51 }
 0x2e1   :  { %2088 = vmatprep.subr.mxu1 %v2461_v38 }
 0x2e3   :  { %2081 = vmatmul.mubr.msk.f32.vlgmr.msra.gmra.mrb[4].mxu1 %vm260_vm2, %v251_v52 }
 0x2e4   :  { %2090 = vmatprep.mubr.msk.f32.mxu1 %vm2462_vm1, %v2461_v38 }
 0x342   :  { %v491_v53 = vpop.permute.xlu1 %490 }
 0x343   :  { %v414_v54 = vpop.permute.xlu0 %413  ;;  %2089 = vmatpush3.xpose.msk.msra.mxu1 %vm260_vm2, %v491_v53 }
 0x344   :  { %2084 = vmatpush3.xpose.msk.msra.mxu0 %vm260_vm2, %v414_v54  ;;  %2098 = vmatprep.subr.mxu1 %v2461_v38 }
 0x345   :  { %2093 = vmatprep.subr.mxu0 %v2461_v38 }
 0x346   :  { %2091 = vmatmul.mubr.msk.f32.vlgmr.msra.gmra.mrb[6].mxu1 %vm260_vm2, %v253_v55 }
 0x347   :  { %2086 = vmatmul.mubr.msk.f32.vlgmr.msra.gmra.mrb[0].mxu0 %vm260_vm2, %v252_v56  ;;  %v568_v57 = vpop.permute.xlu0 %567  ;;  %2100 = vmatprep.mubr.msk.f32.mxu1 %vm2462_vm1, %v2461_v38 }
 0x348   :  { %2094 = vmatpush3.xpose.msk.msra.mxu0 %vm260_vm2, %v568_v57  ;;  %2095 = vmatprep.mubr.msk.f32.mxu0 %vm2462_vm1, %v2461_v38 }
 0x349   :  { %2103 = vmatprep.subr.mxu0 %v2461_v38 }
 0x34a   :  { %v645_v59 = vpop.permute.xlu1 %644 }
 0x34b   :  { %2096 = vmatmul.mubr.msk.f32.vlgmr.msra.gmra.mrb[2].mxu0 %vm260_vm2, %v254_v58  ;;  %v722_v60 = vpop.permute.xlu0 %721  ;;  %2099 = vmatpush3.xpose.msk.msra.mxu1 %vm260_vm2, %v645_v59 }
 0x34c   :  { %2104 = vmatpush3.xpose.msk.msra.mxu0 %vm260_vm2, %v722_v60  ;;  %2105 = vmatprep.mubr.msk.f32.mxu0 %vm2462_vm1, %v2461_v38 }
 0x34d   :  { %2108 = vmatprep.subr.mxu1 %v2461_v38  ;;  %2113 = vmatprep.subr.mxu0 %v2461_v38 }
 0x34e   :  { %v799_v63 = vpop.permute.xlu1 %798  ;;  %2101 = vmatmul.mubr.msk.f32.vlgmr.msra.gmra.mrb[8].mxu1 %vm260_vm2, %v255_v61 }
 0x34f   :  { %2106 = vmatmul.mubr.msk.f32.vlgmr.msra.gmra.mrb[4].mxu0 %vm260_vm2, %v256_v62  ;;  %2109 = vmatpush3.xpose.msk.msra.mxu1 %vm260_vm2, %v799_v63 }
 0x350   :  { %2110 = vmatprep.mubr.msk.f32.mxu1 %vm2462_vm1, %v2461_v38  ;;  %2118 = vmatprep.subr.mxu1 %v2461_v38 }
 0x351   :  { %2115 = vmatprep.mubr.msk.f32.mxu0 %vm2462_vm1, %v2461_v38 }
 0x352   :  { %2111 = vmatmul.mubr.msk.f32.vlgmr.msra.gmra.mrb[10].mxu1 %vm260_vm2, %v257_v2 }
 0x353   :  { %2120 = vmatprep.mubr.msk.f32.mxu1 %vm2462_vm1, %v2461_v38 }
 0x3af   :  { %v332_v7 = vpop.f32.mrb[2].mxu1 }
 0x3b0   :  { %v882_v8 = vsel %vm2680_vm3, %v332_v7, -10000.0  ;;  %v2077_v9 = vpop.f32.mrb[3].mxu1 }
 0x3b1   :  { %v890_v10 = vsel %vm260_vm2, %v882_v8, -inf }
 0x3b2   :  { %891 = vmax.xlane.f32.xlu0 %v890_v10 }
 0x3b6   :  { %v409_v11 = vpop.f32.mrb[4].mxu1 }
 0x3b7   :  { %v883_v12 = vsel %vm2680_vm3, %v409_v11, -10000.0  ;;  %v2082_v13 = vpop.f32.mrb[5].mxu1 }
 0x3b8   :  { %v893_v18 = vsel %vm260_vm2, %v883_v12, -inf }
 0x3b9   :  { %894 = vmax.xlane.f32.xlu1 %v893_v18 }
 0x419   :  { %v563_v20 = vpop.f32.mrb[6].mxu1 }
 0x41a   :  { %v885_v21 = vsel %vm2680_vm3, %v563_v20, -10000.0  ;;  %v486_v22 = vpop.f32.mrb[0].mxu0  ;;  %v2092_v23 = vpop.f32.mrb[7].mxu1 }
 0x41b   :  { %v2087_v24 = vpop.f32.mrb[1].mxu0  ;;  %v899_v25 = vsel %vm260_vm2, %v885_v21, -inf  ;;  %v884_v26 = vsel %vm2680_vm3, %v486_v22, -10000.0 }
 0x41c   :  { %900 = vmax.xlane.f32.xlu0 %v899_v25  ;;  %v896_v29 = vsel %vm260_vm2, %v884_v26, -inf }
 0x41e   :  { %v640_v27 = vpop.f32.mrb[2].mxu0 }
 0x41f   :  { %v2097_v28 = vpop.f32.mrb[3].mxu0  ;;  %v886_v30 = vsel %vm2680_vm3, %v640_v27, -10000.0 }
 0x420   :  { %897 = vmax.xlane.f32.xlu0 %v896_v29  ;;  %v902_v36 = vsel %vm260_vm2, %v886_v30, -inf }
 0x421   :  { %v717_v31 = vpop.f32.mrb[8].mxu1 }
 0x422   :  { %v887_v32 = vsel %vm2680_vm3, %v717_v31, -10000.0  ;;  %v2102_v33 = vpop.f32.mrb[9].mxu1  ;;  %v794_v34 = vpop.f32.mrb[4].mxu0 }
 0x423   :  { %v2107_v35 = vpop.f32.mrb[5].mxu0  ;;  %v905_v37 = vsel %vm260_vm2, %v887_v32, -inf  ;;  %v888_v39 = vsel %vm2680_vm3, %v794_v34, -10000.0 }
 0x424   :  { %903 = vmax.xlane.f32.xlu0 %v902_v36  ;;  %906 = vmax.xlane.f32.xlu1 %v905_v37  ;;  %v908_v51 = vsel %vm260_vm2, %v888_v39, -inf }
 0x425   :  { %v871_v41 = vpop.f32.mrb[10].mxu1 }
 0x426   :  { %v889_v48 = vsel %vm2680_vm3, %v871_v41, -10000.0  ;;  %v2112_v49 = vpop.f32.mrb[11].mxu1 }
 0x427   :  { %v911_v52 = vsel %vm260_vm2, %v889_v48, -inf }
 0x428   :  { %909 = vmax.xlane.f32.xlu0 %v908_v51  ;;  %912 = vmax.xlane.f32.xlu1 %v911_v52 }
 0x439   :  { %1054 = vrot.lane.b32.xlu1 %v2602_v40, %s2467_s14 }
 0x43d   :  { %1130 = vrot.lane.b32.xlu1 %v2617_v44, %s2467_s14 }
 0x43e   :  { %978 = vrot.lane.b32.xlu0 %v2604_v42, %s2467_s14 }
 0x43f   :  { %v892_v53 = vpop.xlane.xlu0 %891 }
 0x440   :  { %v914_v54 = vsub.f32 %v882_v8, %v892_v53 }
 0x441   :  { %1206 = vrot.lane.b32.xlu1 %v2614_v43, %s2467_s14 }
 0x442   :  { %1282 = vrot.lane.b32.xlu0 %v2620_v45, %s2467_s14  ;;  %v922_v55 = vmul.f32 1.442695, %v914_v54 }
 0x444   :  { %2297 = vpow2.f32 %v922_v55 }
 0x445   :  { %1358 = vrot.lane.b32.xlu1 %v2625_v47, %s2467_s14 }
 0x446   :  { %v895_v56 = vpop.xlane.xlu1 %894 }
 0x447   :  { %v915_v40 = vsub.f32 %v883_v12, %v895_v56 }
 0x449   :  { %v924_v57 = vmul.f32 1.442695, %v915_v40 }
 0x44b   :  { %2299 = vpow2.f32 %v924_v57 }
 0x44e   :  { %v2720_v44 = vpop.eup %2297 }
 0x44f   :  { %v938_v42 = vsel %vm260_vm2, %v2720_v44, 0.0 }
 0x455   :  { %v2724_v43 = vpop.eup %2299 }
 0x456   :  { %v941_v45 = vsel %vm260_vm2, %v2724_v43, 0.0 }
 0x461   :  { %939 = vadd.xlane.f32.xlu0 %v938_v42 }
 0x469   :  { %942 = vadd.xlane.f32.xlu1 %v941_v45 }
 0x4a9   :  { %v901_v47 = vpop.xlane.xlu0 %900 }
 0x4aa   :  { %v917_v58 = vsub.f32 %v885_v21, %v901_v47 }
 0x4ac   :  { %v928_v59 = vmul.f32 1.442695, %v917_v58 }
 0x4ad   :  { %v898_v60 = vpop.xlane.xlu0 %897 }
 0x4ae   :  { %2301 = vpow2.f32 %v928_v59  ;;  %v916_v61 = vsub.f32 %v884_v26, %v898_v60 }
 0x4b0   :  { %v926_v62 = vmul.f32 1.442695, %v916_v61 }
 0x4b1   :  { %v904_v63 = vpop.xlane.xlu0 %903  ;;  %v907_v2 = vpop.xlane.xlu1 %906 }
 0x4b2   :  { %2303 = vpow2.f32 %v926_v62  ;;  %v918_v3 = vsub.f32 %v886_v30, %v904_v63  ;;  %v919_v4 = vsub.f32 %v887_v32, %v907_v2 }
 0x4b4   :  { %v930_v5 = vmul.f32 1.442695, %v918_v3  ;;  %v932_v6 = vmul.f32 1.442695, %v919_v4 }
 0x4b5   :  { %v910_v7 = vpop.xlane.xlu0 %909  ;;  %v913_v8 = vpop.xlane.xlu1 %912 }
 0x4b6   :  { %2305 = vpow2.f32 %v930_v5  ;;  %v920_v9 = vsub.f32 %v888_v39, %v910_v7  ;;  %v921_v10 = vsub.f32 %v889_v48, %v913_v8 }
 0x4b7   :  { %2307 = vpow2.f32 %v932_v6 }
 0x4b8   :  { %v2302_v11 = vpop.eup %2301  ;;  %v934_v12 = vmul.f32 1.442695, %v920_v9  ;;  %v936_v13 = vmul.f32 1.442695, %v921_v10 }
 0x4b9   :  { %v979_v18 = vpop.permute.xlu0 %978  ;;  %v1055_v20 = vpop.permute.xlu1 %1054  ;;  %v947_v21 = vsel %vm260_vm2, %v2302_v11, 0.0 }
 0x4ba   :  { %2309 = vpow2.f32 %v934_v12  ;;  %2114 = vmatpush3.msra.mxu0 %v979_v18  ;;  %948 = vadd.xlane.f32.xlu1 %v947_v21 }
 0x4bb   :  { %2311 = vpow2.f32 %v936_v13  ;;  %2119 = vmatpush3.msra.mxu1 %v1055_v20  ;;  %2123 = vmatprep.subr.mxu0 %v2461_v38 }
 0x4bc   :  { %v2304_v22 = vpop.eup %2303  ;;  %2128 = vmatprep.subr.mxu1 %v2461_v38 }
 0x4bd   :  { %v944_v23 = vsel %vm260_vm2, %v2304_v22, 0.0  ;;  %v1131_v32 = vpop.permute.xlu1 %1130  ;;  %v1283_v33 = vpop.permute.xlu0 %1282 }
 0x4be   :  { %945 = vadd.xlane.f32.xlu0 %v944_v23 }
 0x4c0   :  { %v2306_v24 = vpop.eup %2305 }
 0x4c1   :  { %v2732_v25 = vpop.eup %2307  ;;  %v950_v26 = vsel %vm260_vm2, %v2306_v24, 0.0  ;;  %v1207_v34 = vpop.permute.xlu1 %1206 }
 0x4c2   :  { %951 = vadd.xlane.f32.xlu0 %v950_v26  ;;  %v953_v27 = vsel %vm260_vm2, %v2732_v25, 0.0 }
 0x4c3   :  { %954 = vadd.xlane.f32.xlu1 %v953_v27 }
 0x4c4   :  { %v2737_v28 = vpop.eup %2309 }
 0x4c5   :  { %v2739_v29 = vpop.eup %2311  ;;  %v956_v30 = vsel %vm260_vm2, %v2737_v28, 0.0  ;;  %v1359_v36 = vpop.permute.xlu1 %1358 }
 0x4c6   :  { %957 = vadd.xlane.f32.xlu0 %v956_v30  ;;  %v959_v31 = vsel %vm260_vm2, %v2739_v29, 0.0 }
 0x4c7   :  { %960 = vadd.xlane.f32.xlu1 %v959_v31 }
 0x4d8   :  { %1510 = vrot.lane.b32.xlu1 %v2632_v50, %s2467_s14 }
 0x4dc   :  { %1434 = vrot.lane.b32.xlu0 %v2622_v46, %s2467_s14 }
 0x4e0   :  { %2284 = vrot.lane.b32.xlu0 %v2283_v17, %s2468_s15 }
 0x4ee   :  { %v940_v35 = vpop.xlane.xlu0 %939 }
 0x4ef   :  { %2313 = vrcp.f32 %v940_v35 }
 0x4f6   :  { %v943_v37 = vpop.xlane.xlu1 %942 }
 0x4f7   :  { %2315 = vrcp.f32 %v943_v37  ;;  %v1985_v37 = vld [vmem:[#allocation5 + $0x4] ss:$0 sm:$0xff] }
 0x4f9   :  { %v2314_v39 = vpop.eup %2313 }
 0x4fa   :  { %v963_v41 = vmul.f32 %v2314_v39, %v2720_v44  ;;  %v2288_v44 = vpack.i.bf16 %v2590_v19, %v2584_v16 }
 0x4fc   :  { %2116 = vmatmul.mubr.msk.f32.vlgmr.msra.gmra.mrb[6].mxu0 %vm260_vm2, %v963_v41  ;;  %2289 = vrot.lane.b32.xlu1 %v2288_v44, %s2468_s15 }
 0x4fd   :  { %2124 = vmatpush3.msra.mxu0 %v1131_v32  ;;  %2125 = vmatprep.mubr.msk.f32.mxu0 %vm2462_vm1, %v2461_v38 }
 0x4fe   :  { %2133 = vmatprep.subr.mxu0 %v2461_v38 }
 0x501   :  { %v2316_v46 = vpop.eup %2315 }
 0x502   :  { %v965_v50 = vmul.f32 %v2316_v46, %v2724_v43 }
 0x504   :  { %2121 = vmatmul.mubr.msk.f32.vlgmr.msra.gmra.mrb[12].mxu1 %vm260_vm2, %v965_v50 }
 0x505   :  { %2129 = vmatpush3.msra.mxu1 %v1207_v34  ;;  %2130 = vmatprep.mubr.msk.f32.mxu1 %vm2462_vm1, %v2461_v38 }
 0x506   :  { %2138 = vmatprep.subr.mxu1 %v2461_v38 }
 0x547   :  { %v949_v48 = vpop.xlane.xlu1 %948 }
 0x548   :  { %2317 = vrcp.f32 %v949_v48 }
 0x54b   :  { %v946_v49 = vpop.xlane.xlu0 %945 }
 0x54c   :  { %2319 = vrcp.f32 %v946_v49 }
 0x54f   :  { %v952_v51 = vpop.xlane.xlu0 %951 }
 0x550   :  { %2321 = vrcp.f32 %v952_v51  ;;  %v955_v52 = vpop.xlane.xlu1 %954 }
 0x551   :  { %2323 = vrcp.f32 %v955_v52 }
 0x552   :  { %v2318_v53 = vpop.eup %2317 }
 0x553   :  { %v969_v54 = vmul.f32 %v2318_v53, %v2302_v11  ;;  %v958_v55 = vpop.xlane.xlu0 %957 }
 0x554   :  { %2325 = vrcp.f32 %v958_v55  ;;  %v961_v56 = vpop.xlane.xlu1 %960 }
 0x555   :  { %2327 = vrcp.f32 %v961_v56  ;;  %2131 = vmatmul.mubr.msk.f32.vlgmr.msra.gmra.mrb[14].mxu1 %vm260_vm2, %v969_v54 }
 0x556   :  { %v2320_v40 = vpop.eup %2319  ;;  %2139 = vmatpush3.msra.mxu1 %v1359_v36  ;;  %2140 = vmatprep.mubr.msk.f32.mxu1 %vm2462_vm1, %v2461_v38 }
 0x557   :  { %v967_v57 = vmul.f32 %v2320_v40, %v2304_v22  ;;  %2148 = vmatprep.subr.mxu1 %v2461_v38  ;;  %v1435_v16 = vpop.permute.xlu0 %1434 }
 0x558   :  { %v1511_v58 = vpop.permute.xlu1 %1510 }
 0x559   :  { %2126 = vmatmul.mubr.msk.f32.vlgmr.msra.gmra.mrb[8].mxu0 %vm260_vm2, %v967_v57 }
 0x55a   :  { %v2322_v42 = vpop.eup %2321  ;;  %2134 = vmatpush3.msra.mxu0 %v1283_v33  ;;  %2135 = vmatprep.mubr.msk.f32.mxu0 %vm2462_vm1, %v2461_v38 }
 0x55b   :  { %v2324_v43 = vpop.eup %2323  ;;  %v971_v45 = vmul.f32 %v2322_v42, %v2306_v24  ;;  %2143 = vmatprep.subr.mxu0 %v2461_v38  ;;  %v2285_v59 = vpop.permute.xlu0 %2284 }
 0x55c   :  { %v973_v47 = vmul.f32 %v2324_v43, %v2732_v25  ;;  %v2287_v60 = vunpack.i.h.bf16 %v2285_v59  ;;  %v2286_v61 = vunpack.i.l.bf16 %v2285_v59  ;;  %v85_v43 = vld [vmem:[#allocation8] sm:$0xff] }
 0x55d   :  { %2136 = vmatmul.mubr.msk.f32.vlgmr.msra.gmra.mrb[10].mxu0 %vm260_vm2, %v971_v45  ;;  %v86_v45 = vld [vmem:[#allocation8 + $0x8] sm:$0xff] }
 0x55e   :  { %v2326_v19 = vpop.eup %2325  ;;  %2141 = vmatmul.mubr.msk.f32.vlgmr.msra.gmra.mrb[16].mxu1 %vm260_vm2, %v973_v47  ;;  %2144 = vmatpush3.msra.mxu0 %v1435_v16  ;;  %v2218_v3 = vpack.c.bf16 %v2287_v60, %v2286_v61  ;;  %v2226_v47 = vpack.c.bf16 %v86_v45, %v85_v43  ;;  %v87_v16 = vld [vmem:[#allocation8 + $0x10] sm:$0xff]  ;;  %v92_v60 = vld [vmem:[#allocation8 + $0x38] sm:$0xff] }
 0x55f   :  { %v2328_v14 = vpop.eup %2327  ;;  %v975_v15 = vmul.f32 %v2326_v19, %v2737_v28  ;;  %2149 = vmatpush3.msra.mxu1 %v1511_v58  ;;  %2145 = vmatprep.mubr.msk.f32.mxu0 %vm2462_vm1, %v2461_v38  ;;  %v88_v19 = vld [vmem:[#allocation8 + $0x18] sm:$0xff] }
 0x560   :  { %v977_v17 = vmul.f32 %v2328_v14, %v2739_v29  ;;  %2150 = vmatprep.mubr.msk.f32.mxu1 %vm2462_vm1, %v2461_v38  ;;  %2219 = vmatprep.subr.bf16.mxu1 %v2218_v3  ;;  %v2230_v58 = vpack.c.bf16 %v88_v19, %v87_v16  ;;  %v89_v14 = vld [vmem:[#allocation8 + $0x20] sm:$0xff] }
 0x561   :  { %2146 = vmatmul.mubr.msk.f32.vlgmr.msra.gmra.mrb[12].mxu0 %vm260_vm2, %v975_v15  ;;  %v90_v15 = vld [vmem:[#allocation8 + $0x28] sm:$0xff] }
 0x562   :  { %2151 = vmatmul.mubr.msk.f32.vlgmr.msra.gmra.mrb[18].mxu1 %vm260_vm2, %v977_v17  ;;  %v91_v17 = vld [vmem:[#allocation8 + $0x30] sm:$0xff]  ;;  %v2234_v59 = vpack.c.bf16 %v90_v15, %v89_v14 }
 0x563   :  { %2221 = vmatpush3.bf16.msra.mxu1 %v2218_v3  ;;  %v2238_v61 = vpack.c.bf16 %v92_v60, %v91_v17 }
 0x564   :  { %2235 = vmatprep.subr.bf16.mxu0 %v2234_v59 }
 0x565   :  { %2237 = vmatpush3.bf16.msra.mxu0 %v2234_v59 }
 0x566   :  { %2239 = vmatprep.subr.bf16.mxu0 %v2238_v61 }
 0x569   :  { %2241 = vmatpush3.bf16.msra.mxu0 %v2238_v61 }
 0x56e   :  { %v2290_v62 = vpop.permute.xlu1 %2289 }
 0x56f   :  { %v2292_v63 = vunpack.i.h.bf16 %v2290_v62  ;;  %v2291_v2 = vunpack.i.l.bf16 %v2290_v62  ;;  %v93_v62 = vld [vmem:[#allocation8 + $0x40] sm:$0xff] }
 0x571   :  { %v2222_v6 = vpack.c.bf16 %v2292_v63, %v2291_v2  ;;  %v94_v63 = vld [vmem:[#allocation8 + $0x48] sm:$0xff] }
 0x572   :  { %v2242_v2 = vpack.c.bf16 %v94_v63, %v93_v62 }
 0x573   :  { %2223 = vmatprep.subr.bf16.mxu1 %v2222_v6 }
 0x574   :  { %2225 = vmatpush3.bf16.msra.mxu1 %v2222_v6  ;;  %2243 = vmatprep.subr.bf16.mxu0 %v2242_v2 }
 0x575   :  { %2227 = vmatprep.subr.bf16.mxu1 %v2226_v47  ;;  %2245 = vmatpush3.bf16.msra.mxu0 %v2242_v2 }
 0x5cf   :  { %v1050_v4 = vpop.f32.mrb[6].mxu0 }
 0x5d0   :  { %v2117_v5 = vpop.f32.mrb[7].mxu0 }
 0x5d7   :  { %v1126_v7 = vpop.f32.mrb[12].mxu1 }
 0x5d8   :  { %v2122_v38 = vpop.f32.mrb[13].mxu1 }
 0x628   :  { %v1278_v8 = vpop.f32.mrb[14].mxu1 }
 0x629   :  { %1590 = vrot.lane.b32.xlu1 %v1278_v8, %s2458_s11  ;;  %v2132_v9 = vpop.f32.mrb[15].mxu1 }
 0x62a   :  { %v1988_v9 = vld [vmem:[#allocation5 + $0x2] ss:$0 sm:$0xff] }
 0x62c   :  { %v1202_v10 = vpop.f32.mrb[8].mxu0 }
 0x62d   :  { %1588 = vrot.lane.b32.xlu0 %v1202_v10, %s2458_s11  ;;  %v2127_v11 = vpop.f32.mrb[9].mxu0 }
 0x62e   :  { %v1989_v11 = vld [vmem:[#allocation5 + $0x3] ss:$0 sm:$0xff] }
 0x630   :  { %v1354_v12 = vpop.f32.mrb[10].mxu0 }
 0x631   :  { %v1430_v13 = vpop.f32.mrb[16].mxu1  ;;  %1596 = vrot.lane.b32.xlu0 %v1354_v12, %s2469_s16  ;;  %v2137_v18 = vpop.f32.mrb[11].mxu0 }
 0x632   :  { %1598 = vrot.lane.b32.xlu1 %v1430_v13, %s2469_s16  ;;  %v2142_v20 = vpop.f32.mrb[17].mxu1 }
 0x634   :  { %v1506_v21 = vpop.f32.mrb[12].mxu0 }
 0x635   :  { %v1582_v22 = vpop.f32.mrb[18].mxu1  ;;  %1604 = vrot.lane.b32.xlu0 %v1506_v21, %s2470_s17  ;;  %v2147_v23 = vpop.f32.mrb[13].mxu0 }
 0x636   :  { %1606 = vrot.lane.b32.xlu1 %v1582_v22, %s2470_s17  ;;  %v2152_v24 = vpop.f32.mrb[19].mxu1  ;;  %v95_v23 = vld [vmem:[#allocation8 + $0x50] sm:$0xff] }
 0x637   :  { %v96_v24 = vld [vmem:[#allocation8 + $0x58] sm:$0xff] }
 0x69b   :  { %v1591_v26 = vpop.permute.xlu1 %1590 }
 0x69c   :  { %v1611_v30 = vsel %vm260_vm2, %v1126_v7, %v1591_v26  ;;  %v97_v26 = vld [vmem:[#allocation8 + $0x60] sm:$0xff] }
 0x69f   :  { %v1589_v25 = vpop.permute.xlu0 %1588 }
 0x6a0   :  { %v1610_v29 = vsel %vm260_vm2, %v1050_v4, %v1589_v25  ;;  %v2246_v25 = vpack.c.bf16 %v96_v24, %v95_v23 }
 0x6a2   :  { %2247 = vmatprep.subr.bf16.mxu0 %v2246_v25 }
 0x6a3   :  { %v1597_v27 = vpop.permute.xlu0 %1596  ;;  %2249 = vmatpush3.bf16.msra.mxu0 %v2246_v25 }
 0x6a4   :  { %v1599_v28 = vpop.permute.xlu1 %1598  ;;  %v1613_v31 = vsel %vm1612_vm4, %v1610_v29, %v1597_v27  ;;  %v98_v27 = vld [vmem:[#allocation8 + $0x68] sm:$0xff]  ;;  %v99_v29 = vld [vmem:[#allocation8 + $0x70] sm:$0xff] }
 0x6a5   :  { %v1614_v33 = vsel %vm1612_vm4, %v1611_v30, %v1599_v28  ;;  %v2250_v28 = vpack.c.bf16 %v98_v27, %v97_v26  ;;  %v100_v30 = vld [vmem:[#allocation8 + $0x78] sm:$0xff] }
 0x6a7   :  { %v1605_v32 = vpop.permute.xlu0 %1604  ;;  %2251 = vmatprep.subr.bf16.mxu0 %v2250_v28 }
 0x6a8   :  { %v1616_v34 = vsel %vm1615_vm5, %v1613_v31, %v1605_v32  ;;  %v1607_v35 = vpop.permute.xlu1 %1606  ;;  %2253 = vmatpush3.bf16.msra.mxu0 %v2250_v28  ;;  %v2254_v31 = vpack.c.bf16 %v100_v30, %v99_v29  ;;  %v101_v32 = vld [vmem:[#allocation8 + $0x80] sm:$0xff] }
 0x6a9   :  { %v1617_v36 = vsel %vm1615_vm5, %v1614_v33, %v1607_v35  ;;  %2161 = vmatprep.mubr.msk.f32.mxu1 %vm105_vm0, %v1616_v34  ;;  %v102_v33 = vld [vmem:[#allocation8 + $0x88] sm:$0xff]  ;;  %v103_v35 = vld [vmem:[#allocation8 + $0x90] sm:$0xff] }
 0x6aa   :  { %2162 = vmatmul.mubr.msk.f32.vlgmr.msra.gmra.mrb[20].mxu1 %vm105_vm0, %v1617_v36  ;;  %2255 = vmatprep.subr.bf16.mxu0 %v2254_v31  ;;  %v2258_v34 = vpack.c.bf16 %v102_v33, %v101_v32  ;;  %v104_v36 = vld [vmem:[#allocation8 + $0x98] sm:$0xff] }
 0x6ab   :  { %2229 = vmatpush3.bf16.msra.mxu1 %v2226_v47 }
 0x6ac   :  { %2231 = vmatprep.subr.bf16.mxu1 %v2230_v58  ;;  %2257 = vmatpush3.bf16.msra.mxu0 %v2254_v31 }
 0x6ad   :  { %2259 = vmatprep.subr.bf16.mxu0 %v2258_v34 }
 0x6af   :  { %2233 = vmatpush3.bf16.msra.mxu1 %v2230_v58 }
 0x6b0   :  { %2261 = vmatpush3.bf16.msra.mxu0 %v2258_v34 }
 0x77d   :  { %v2163_v39 = vpop.f32.mrb[20].mxu1 }
 0x77e   :  { %v1716_v41 = vadd.f32 %v2163_v39, %v1985_v37  ;;  %v1710_v46 = vpop.f32.mrb[21].mxu1  ;;  %v1990_v39 = vld [vmem:[#allocation5 + $0x6] ss:$0 sm:$0xff] }
 0x77f   :  { %v1711_v50 = vadd.f32 %v1985_v37, %v1710_v46  ;;  %v2262_v37 = vpack.c.bf16 %v104_v36, %v103_v35 }
 0x780   :  { %v2790_v48 = vadd.f32 %v1716_v41, %v2570_v1 }
 0x781   :  { %v2793_v49 = vadd.f32 %v1711_v50, %v2568_v0  ;;  %2263 = vmatprep.subr.bf16.mxu0 %v2262_v37 }
 0x782   :  { %v1724_v51 = vsel %vm105_vm0, %v2790_v48, 0.0  ;;  %2265 = vmatpush3.bf16.msra.mxu0 %v2262_v37 }
 0x783   :  { %1725 = vadd.xlane.f32.xlu1 %v1724_v51  ;;  %v1721_v52 = vsel %vm105_vm0, %v2793_v49, 0.0 }
 0x784   :  { %1722 = vadd.xlane.f32.xlu0 %v1721_v52 }
 0x810   :  { %v1726_v53 = vpop.xlane.xlu1 %1725 }
 0x811   :  { %v1728_v54 = vmul.f32 0.03125, %v1726_v53  ;;  %v1723_v55 = vpop.xlane.xlu0 %1722 }
 0x812   :  { %v1727_v56 = vmul.f32 0.03125, %v1723_v55 }
 0x813   :  { %v1730_v40 = vsub.f32 %v2790_v48, %v1728_v54 }
 0x814   :  { %v1729_v1 = vsub.f32 %v2793_v49, %v1727_v56 }
 0x815   :  { %v1732_v44 = vmul.f32 %v1730_v40, %v1730_v40 }
 0x816   :  { %v1731_v57 = vmul.f32 %v1729_v1, %v1729_v1 }
 0x817   :  { %v1736_v42 = vsel %vm105_vm0, %v1732_v44, 0.0 }
 0x818   :  { %v1733_v0 = vsel %vm105_vm0, %v1731_v57, 0.0 }
 0x819   :  { %1734 = vadd.xlane.f32.xlu0 %v1733_v0 }
 0x81d   :  { %1737 = vadd.xlane.f32.xlu0 %v1736_v42  ;;  %v1993_v42 = vld [vmem:[#allocation5 + $0x5] ss:$0 sm:$0xff] }
 0x8a6   :  { %v1735_v3 = vpop.xlane.xlu0 %1734 }
 0x8a7   :  { %v1739_v4 = vmul.f32 0.03125, %v1735_v3 }
 0x8a9   :  { %v1741_v5 = vadd.f32 1e-05, %v1739_v4 }
 0x8aa   :  { %v1738_v6 = vpop.xlane.xlu0 %1737 }
 0x8ab   :  { %2329 = vrsqrt.f32 %v1741_v5  ;;  %v1740_v7 = vmul.f32 0.03125, %v1738_v6 }
 0x8ad   :  { %v1742_v38 = vadd.f32 1e-05, %v1740_v7 }
 0x8af   :  { %2331 = vrsqrt.f32 %v1742_v38 }
 0x8b5   :  { %v2330_v8 = vpop.eup %2329 }
 0x8b6   :  { %v1745_v10 = vmul.f32 %v2330_v8, %v1729_v1 }
 0x8b8   :  { %v1751_v12 = vmul.f32 %v1988_v9, %v1745_v10 }
 0x8b9   :  { %v2332_v13 = vpop.eup %2331 }
 0x8ba   :  { %v1746_v18 = vmul.f32 %v2332_v13, %v1730_v40  ;;  %v1757_v20 = vadd.f32 %v1989_v11, %v1751_v12 }
 0x8bc   :  { %v1752_v21 = vmul.f32 %v1988_v9, %v1746_v18  ;;  %2172 = vmatprep.mubr.msk.f32.mxu1 %vm105_vm0, %v1757_v20 }
 0x8be   :  { %v1758_v22 = vadd.f32 %v1989_v11, %v1752_v21 }
 0x8c0   :  { %2173 = vmatmul.mubr.msk.f32.vlgmr.msra.gmra.mrb[22].mxu1 %vm105_vm0, %v1758_v22 }
 0x993   :  { %v2174_v41 = vpop.f32.mrb[22].mxu1 }
 0x994   :  { %v1841_v46 = vadd.f32 %v2174_v41, %v1990_v39  ;;  %v1835_v50 = vpop.f32.mrb[23].mxu1 }
 0x995   :  { %v1836_v51 = vadd.f32 %v1990_v39, %v1835_v50 }
 0x996   :  { %v1847_v52 = vmul.f32 0.70710677, %v1841_v46  ;;  %v1845_v57 = vmul.f32 0.5, %v1841_v46 }
 0x997   :  { %v1846_v53 = vmul.f32 0.70710677, %v1836_v51  ;;  %v1844_v40 = vmul.f32 0.5, %v1836_v51 }
 0x998   :  { %2333 = verf.f32 %v1847_v52 }
 0x999   :  { %2335 = verf.f32 %v1846_v53 }
 0x9a2   :  { %v2334_v54 = vpop.eup %2333 }
 0x9a3   :  { %v2336_v55 = vpop.eup %2335  ;;  %v1851_v56 = vadd.f32 1.0, %v2334_v54 }
 0x9a4   :  { %v1850_v1 = vadd.f32 1.0, %v2336_v55 }
 0x9a5   :  { %v1853_v44 = vmul.f32 %v1851_v56, %v1845_v57 }
 0x9a6   :  { %v1852_v0 = vmul.f32 %v1850_v1, %v1844_v40 }
 0x9a8   :  { %2207 = vmatprep.mubr.f32.mxu0 %v1852_v0 }
 0x9a9   :  { %2208 = vmatmul.mubr.f32.vlgmr.msra.gmra.mrb[14].mxu0 %v1853_v44 }
 0xa7c   :  { %v2209_v43 = vpop.f32.mrb[14].mxu0 }
 0xa7d   :  { %v1930_v45 = vadd.f32 %v2209_v43, %v1993_v42  ;;  %v1924_v47 = vpop.f32.mrb[15].mxu0 }
 0xa7e   :  { %v1925_v16 = vadd.f32 %v1993_v42, %v1924_v47 }
 0xa7f   :  { %v1934_v19 = vadd.f32 %v1930_v45, %v2790_v48 }
 0xa80   :  { %v1933_v58 = vadd.f32 %v1925_v16, %v2793_v49 }
 0xa81   :  { %1936 = vst.msk [vmem:[#allocation10 + $0x8] sm:$0xff] %vm105_vm0, %v1934_v19 }
 0xa82   :  { %1935 = vst.msk [vmem:[#allocation10] sm:$0xff] %vm105_vm0, %v1933_v58 }
 0xa83   :  { %2436 = shalt.err (!%p2433_p8)
}
 0xa84   :  { %s2437_s24 = scalar_lea.hbm %s2828_s4, 256 }
 0xa85   :  { %p2438_p9 = scmp.ne.s32.totalorder %s2828_s4, %s2437_s24  ;;  %p2441_p10 = scmp.lt.u32.totalorder %s2437_s24, %s2828_s4 }
 0xa87   :  { %p2443_p11 = pnand %p2441_p10, %p2438_p9 }
 0xa89   :  { %2446 = shalt.err (!%p2443_p11)
}
 0xa8a   :  { %1948 = dma.vmem_to_hbm [thread:$0]  %s1943_s20, 256, %s2828_s4, [#allocation4], %s2457_s1, %s2457_s1, %s2458_s11  }
 0xa8b   :  { %2453 = dma.done.wait [#allocation4], 256  }
 0xa8c   :  { %2454 = vsyncadd [#allocation4], 4294967040 }
 0xa8d   :  { %1952 = vsyncpa [#allocation3], 1 }
 0xa8e   :  { %1953 = vsyncpa [#allocation6], 1 }
 0xa8f   :  { %1954 = vsyncpa [#allocation9], 1 }
 0xa90   :  { %1955 = vsyncpa [#allocation4], 1 }

</bundles_post_ra>
